<compile_context>
chip_gen: v6e
topology: v6e:2x2x1
jax: 0.10.0
libtpu: 0.0.40
codegen_flags: <defaults>
</compile_context>

<pallas_src>
import functools

import jax
import jax.numpy as jnp
from jax.experimental import pallas as pl
from jax.experimental.pallas import tpu as pltpu


def _round_up(x, m):
    return ((x + m - 1) // m) * m


def _mlp_kernel(x_ref, w1_ref, b1_ref, w2_ref, b2_ref, *out_refs, return_feature):
    # feature = x @ W1 + b1  (W1 pre-transposed to (in, hidden); f32 accumulation).
    feat = jnp.dot(x_ref[...], w1_ref[...], preferred_element_type=jnp.float32)
    feat = feat + b1_ref[...]
    if return_feature:
        feat_ref, out_ref = out_refs
        feat_ref[...] = feat.astype(feat_ref.dtype)
    else:
        (out_ref,) = out_refs
    # out = feature @ W2 + b2  (feature stays in-register; no HBM round trip).
    out = jnp.dot(feat.astype(w2_ref.dtype), w2_ref[...],
                  preferred_element_type=jnp.float32)
    out = out + b2_ref[...]
    out_ref[...] = out.astype(out_ref.dtype)


@functools.partial(
    jax.jit,
    static_argnames=("compute_dtype", "batch_tile", "return_feature", "force_pallas"))
def linear_regression_model_forward(x, w1_t, b1, w2_t, b2, *,
                                    compute_dtype=jnp.float32,
                                    batch_tile=1024,
                                    return_feature=True,
                                    force_pallas=False):
    """Forward pass of LinearRegressionModel.

    Args:
      x:    (batch, input_features) float32
      w1_t: (input_features, hidden_units)  -- extraction weight, pre-transposed
      b1:   (1, hidden_units)
      w2_t: (hidden_units, output_features) -- output weight, pre-transposed
      b2:   (1, output_features)
      compute_dtype: jnp.float32 (exact) or jnp.bfloat16 (half the HBM bytes /
        faster MXU on v6e/v7x; accumulation stays f32, results bf16-accurate).
      batch_tile: max rows of x per grid step.
      return_feature: if False, skip the (batch, hidden) feature writeback.
      force_pallas: run the Pallas kernel even at toy shapes.

    Returns:
      (feature, out) if return_feature else out, all float32.
    """
    batch, in_dim = x.shape
    hidden = w1_t.shape[1]
    out_dim = w2_t.shape[1]
    cd = jnp.dtype(compute_dtype)
    itemsize = cd.itemsize

    # Toy-size fast path: one fused XLA dot beats pallas_call + grid overhead.
    if not force_pallas and batch * (in_dim + hidden + out_dim) < (1 << 15):
        feat = (x.astype(cd) @ w1_t.astype(cd)).astype(jnp.float32) + b1.astype(jnp.float32)
        out = (feat.astype(cd) @ w2_t.astype(cd)).astype(jnp.float32) + b2.astype(jnp.float32)
        return (feat, out) if return_feature else out

    # ---- Batch tile selection (no padding anywhere: lane dims use full extents). ----
    # Cap the double-buffered streaming working set (x + outputs) at ~24 MiB so the
    # tile is safe on every generation once vmem_limit_bytes is raised below.
    row_bytes = in_dim * itemsize + ((hidden if return_feature else 0) + out_dim) * 4
    max_tm = max(8, ((24 << 20) // (2 * row_bytes)) // 8 * 8)
    tm = min(batch_tile, _round_up(batch, 8), max_tm)
    tm = max(8, _round_up(tm, 8))
    steps = pl.cdiv(batch, tm)
    # v7x megacore load balance: prefer an even number of grid steps so both
    # TensorCores get equal work (no-op on single-TC v5e/v6e).
    if steps > 1 and steps % 2 == 1:
        tm_even = max(8, _round_up(pl.cdiv(batch, steps + 1), 8))
        if pl.cdiv(batch, tm_even) == steps + 1:
            tm = tm_even
            steps = steps + 1

    # Cast once (no-op on the default f32 path); biases stay f32 (added after f32 acc).
    xc = x if x.dtype == cd else x.astype(cd)
    w1c = w1_t if w1_t.dtype == cd else w1_t.astype(cd)
    w2c = w2_t if w2_t.dtype == cd else w2_t.astype(cd)
    b1f = b1.astype(jnp.float32)
    b2f = b2.astype(jnp.float32)

    def _resident_spec(shape, esize):
        # Constant index_map -> stays VMEM-resident across grid steps. Single-buffer
        # the big resident blocks so the default 2-deep buffer doesn't waste VMEM
        # (matters on v7x's 64 MiB part once weights grow); tiny blocks keep the
        # default, which is also the battle-tested path at the shapes tested below.
        nbytes = shape[0] * shape[1] * esize
        if nbytes >= (1 << 20):
            return pl.BlockSpec(shape, lambda i: (0, 0), pipeline_mode=pl.Buffered(1))
        return pl.BlockSpec(shape, lambda i: (0, 0))

    in_specs = [
        pl.BlockSpec((tm, in_dim), lambda i: (i, 0)),      # x streams over batch
        _resident_spec((in_dim, hidden), itemsize),        # W1 (VMEM-resident)
        _resident_spec((1, hidden), 4),                    # b1
        _resident_spec((hidden, out_dim), itemsize),       # W2
        _resident_spec((1, out_dim), 4),                   # b2
    ]

    if return_feature:
        out_shape = (jax.ShapeDtypeStruct((batch, hidden), jnp.float32),
                     jax.ShapeDtypeStruct((batch, out_dim), jnp.float32))
        out_specs = (pl.BlockSpec((tm, hidden), lambda i: (i, 0)),
                     pl.BlockSpec((tm, out_dim), lambda i: (i, 0)))
    else:
        out_shape = jax.ShapeDtypeStruct((batch, out_dim), jnp.float32)
        out_specs = pl.BlockSpec((tm, out_dim), lambda i: (i, 0))

    # Explicit VMEM budget: 2x streaming tiles + (up to double-buffered) residents
    # + headroom for compiler-internal scratch, clamped to the v7x physical 64 MiB.
    stream_bytes = 2 * tm * row_bytes
    resident_bytes = 2 * ((in_dim * hidden + hidden * out_dim) * itemsize
                          + (hidden + out_dim) * 4)
    vmem_limit = int(stream_bytes + resident_bytes + (8 << 20))
    vmem_limit = min(max(vmem_limit, 16 << 20), 64 << 20)

    # Advisory scheduler hint (lets XLA overlap the surrounding casts with the kernel).
    flops = 2 * batch * hidden * (in_dim + out_dim) + batch * (hidden + out_dim)
    bytes_accessed = (batch * in_dim * itemsize
                      + (in_dim * hidden + hidden * out_dim) * itemsize
                      + (hidden + out_dim) * 4
                      + batch * ((hidden * 4 if return_feature else 0) + out_dim * 4))
    cost = pl.CostEstimate(flops=flops, transcendentals=0,
                           bytes_accessed=bytes_accessed)

    return pl.pallas_call(
        functools.partial(_mlp_kernel, return_feature=return_feature),
        out_shape=out_shape,
        grid=(steps,),
        in_specs=in_specs,
        out_specs=out_specs,
        compiler_params=pltpu.CompilerParams(
            dimension_semantics=("parallel",),   # batch tiles independent -> megacore
            vmem_limit_bytes=vmem_limit,
        ),
        cost_estimate=cost,
    )(xc, w1c, b1f, w2c, b2f)


def init_params(key, input_features, output_features, hidden_units):
    """Deterministic init mimicking PyTorch nn.Linear default (uniform +/- 1/sqrt(fan_in))."""
    k1, k2, k3, k4 = jax.random.split(key, 4)
    bound1 = 1.0 / jnp.sqrt(jnp.float32(input_features))
    bound2 = 1.0 / jnp.sqrt(jnp.float32(hidden_units))
    # Stored pre-transposed: (in, out)
    w1_t = jax.random.uniform(k1, (input_features, hidden_units), jnp.float32,
                              -bound1, bound1)
    b1 = jax.random.uniform(k2, (1, hidden_units), jnp.float32, -bound1, bound1)
    w2_t = jax.random.uniform(k3, (hidden_units, output_features), jnp.float32,
                              -bound2, bound2)
    b2 = jax.random.uniform(k4, (1, output_features), jnp.float32, -bound2, bound2)
    return w1_t, b1, w2_t, b2


if __name__ == "__main__":
    batch = 8
    input_features = 16
    hidden_units = 32
    output_features = 8

    key = jax.random.PRNGKey(0)
    kx, kp = jax.random.split(key)
    x = jax.random.normal(kx, (batch, input_features), jnp.float32)
    w1_t, b1, w2_t, b2 = init_params(kp, input_features, output_features, hidden_units)

    feat_ref = x @ w1_t + b1
    out_ref = feat_ref @ w2_t + b2

    # 1) Pallas path at the toy spec shapes (forced; auto path would fall back to XLA).
    feat, out = linear_regression_model_forward(x, w1_t, b1, w2_t, b2, force_pallas=True)
    jax.block_until_ready((feat, out))
    assert feat.shape == (batch, hidden_units) and out.shape == (batch, output_features)
    assert jnp.allclose(feat, feat_ref, atol=1e-5, rtol=1e-5)
    assert jnp.allclose(out, out_ref, atol=1e-5, rtol=1e-5)

    # 2) Auto path (XLA fallback at toy sizes) must match too.
    feat_a, out_a = linear_regression_model_forward(x, w1_t, b1, w2_t, b2)
    assert jnp.allclose(feat_a, feat_ref, atol=1e-5, rtol=1e-5)
    assert jnp.allclose(out_a, out_ref, atol=1e-5, rtol=1e-5)

    # 3) Multi-tile batch: grid > 1, even step count (megacore balance), masked
    #    partial tail block, no padding copies anywhere.
    batch2 = 600
    x2 = jax.random.normal(kx, (batch2, input_features), jnp.float32)
    feat2, out2 = linear_regression_model_forward(
        x2, w1_t, b1, w2_t, b2, batch_tile=256, force_pallas=True)
    jax.block_until_ready((feat2, out2))
    feat2_ref = x2 @ w1_t + b1
    out2_ref = feat2_ref @ w2_t + b2
    assert jnp.allclose(feat2, feat2_ref, atol=1e-5, rtol=1e-5)
    assert jnp.allclose(out2, out2_ref, atol=1e-5, rtol=1e-5)

    # 4) out-only path (skips the feature HBM writeback entirely).
    out3 = linear_regression_model_forward(
        x2, w1_t, b1, w2_t, b2, batch_tile=256, return_feature=False, force_pallas=True)
    jax.block_until_ready(out3)
    assert jnp.allclose(out3, out2_ref, atol=1e-5, rtol=1e-5)

    print("KERNEL_OK")
</pallas_src>

<mosaic_0001>
module attributes {stable_mosaic.version = 11 : i64} {
  func.func @_mlp_kernel(%arg0: i32, %arg1: memref<8x16xf32, #tpu.memory_space<vmem>>, %arg2: memref<16x32xf32, #tpu.memory_space<vmem>>, %arg3: memref<1x32xf32, #tpu.memory_space<vmem>>, %arg4: memref<32x8xf32, #tpu.memory_space<vmem>>, %arg5: memref<1x8xf32, #tpu.memory_space<vmem>>, %arg6: memref<8x32xf32, #tpu.memory_space<vmem>>, %arg7: memref<8x8xf32, #tpu.memory_space<vmem>>) attributes {dimension_semantics = [#tpu.dimension_semantics<parallel>], iteration_bounds = array<i64: 1>, scalar_prefetch = 0 : i64, scratch_operands = 0 : i64, tpu.core_type = #tpu.core_type<tc>, window_params = [{transform_indices = @transform_0, window_bounds = array<i64: 8, 16>}, {pipeline_mode = #tpu.pipeline_mode<synchronous>, transform_indices = @transform_1, window_bounds = array<i64: 16, 32>}, {pipeline_mode = #tpu.pipeline_mode<synchronous>, transform_indices = @transform_2, window_bounds = array<i64: 1, 32>}, {pipeline_mode = #tpu.pipeline_mode<synchronous>, transform_indices = @transform_3, window_bounds = array<i64: 32, 8>}, {pipeline_mode = #tpu.pipeline_mode<synchronous>, transform_indices = @transform_4, window_bounds = array<i64: 1, 8>}, {transform_indices = @transform_5, window_bounds = array<i64: 8, 32>}, {transform_indices = @transform_6, window_bounds = array<i64: 8, 8>}]} {
    %c0 = arith.constant 0 : index
    %c0_0 = arith.constant 0 : index
    %0 = vector.load %arg1[%c0, %c0_0] : memref<8x16xf32, #tpu.memory_space<vmem>>, vector<8x16xf32>
    %c0_1 = arith.constant 0 : index
    %c0_2 = arith.constant 0 : index
    %1 = vector.load %arg2[%c0_1, %c0_2] : memref<16x32xf32, #tpu.memory_space<vmem>>, vector<16x32xf32>
    %cst = arith.constant dense<0.000000e+00> : vector<8x32xf32>
    %2 = tpu.matmul %0, %1, %cst {dimension_numbers = #tpu.dot_dimension_numbers<[1], [0], [0], [1], [0, 0, 1, 1], [], []>} : vector<8x16xf32>, vector<16x32xf32>, vector<8x32xf32> -> vector<8x32xf32>
    %c0_3 = arith.constant 0 : index
    %c0_4 = arith.constant 0 : index
    %3 = vector.load %arg3[%c0_3, %c0_4] : memref<1x32xf32, #tpu.memory_space<vmem>>, vector<1x32xf32>
    %4 = vector.broadcast %3 : vector<1x32xf32> to vector<8x32xf32>
    %5 = arith.addf %2, %4 : vector<8x32xf32>
    %c0_5 = arith.constant 0 : index
    %c0_6 = arith.constant 0 : index
    %6 = vector.load %arg6[%c0_5, %c0_6] : memref<8x32xf32, #tpu.memory_space<vmem>>, vector<8x32xf32>
    tpu.vector_store %arg6[%c0_5, %c0_6], %5 {strides = array<i32>} : memref<8x32xf32, #tpu.memory_space<vmem>>, vector<8x32xf32>,
    %c0_7 = arith.constant 0 : index
    %c0_8 = arith.constant 0 : index
    %7 = vector.load %arg4[%c0_7, %c0_8] : memref<32x8xf32, #tpu.memory_space<vmem>>, vector<32x8xf32>
    %cst_9 = arith.constant dense<0.000000e+00> : vector<8x8xf32>
    %8 = tpu.matmul %5, %7, %cst_9 {dimension_numbers = #tpu.dot_dimension_numbers<[1], [0], [0], [1], [0, 0, 1, 1], [], []>} : vector<8x32xf32>, vector<32x8xf32>, vector<8x8xf32> -> vector<8x8xf32>
    %c0_10 = arith.constant 0 : index
    %c0_11 = arith.constant 0 : index
    %9 = vector.load %arg5[%c0_10, %c0_11] : memref<1x8xf32, #tpu.memory_space<vmem>>, vector<1x8xf32>
    %10 = vector.broadcast %9 : vector<1x8xf32> to vector<8x8xf32>
    %11 = arith.addf %8, %10 : vector<8x8xf32>
    %c0_12 = arith.constant 0 : index
    %c0_13 = arith.constant 0 : index
    %12 = vector.load %arg7[%c0_12, %c0_13] : memref<8x8xf32, #tpu.memory_space<vmem>>, vector<8x8xf32>
    tpu.vector_store %arg7[%c0_12, %c0_13], %11 {strides = array<i32>} : memref<8x8xf32, #tpu.memory_space<vmem>>, vector<8x8xf32>,
    return
  }
  func.func @transform_0(%arg0: i32) -> (i32, i32) {
    %c0_i32 = arith.constant 0 : i32
    %c0_i32_0 = arith.constant 0 : i32
    return %arg0, %c0_i32 : i32, i32
  }
  func.func @transform_1(%arg0: i32) -> (i32, i32) {
    %c0_i32 = arith.constant 0 : i32
    %c0_i32_0 = arith.constant 0 : i32
    %c0_i32_1 = arith.constant 0 : i32
    return %c0_i32, %c0_i32_0 : i32, i32
  }
  func.func @transform_2(%arg0: i32) -> (i32, i32) {
    %c0_i32 = arith.constant 0 : i32
    %c0_i32_0 = arith.constant 0 : i32
    %c0_i32_1 = arith.constant 0 : i32
    return %c0_i32, %c0_i32_0 : i32, i32
  }
  func.func @transform_3(%arg0: i32) -> (i32, i32) {
    %c0_i32 = arith.constant 0 : i32
    %c0_i32_0 = arith.constant 0 : i32
    %c0_i32_1 = arith.constant 0 : i32
    return %c0_i32, %c0_i32_0 : i32, i32
  }
  func.func @transform_4(%arg0: i32) -> (i32, i32) {
    %c0_i32 = arith.constant 0 : i32
    %c0_i32_0 = arith.constant 0 : i32
    %c0_i32_1 = arith.constant 0 : i32
    return %c0_i32, %c0_i32_0 : i32, i32
  }
  func.func @transform_5(%arg0: i32) -> (i32, i32) {
    %c0_i32 = arith.constant 0 : i32
    %c0_i32_0 = arith.constant 0 : i32
    return %arg0, %c0_i32 : i32, i32
  }
  func.func @transform_6(%arg0: i32) -> (i32, i32) {
    %c0_i32 = arith.constant 0 : i32
    %c0_i32_0 = arith.constant 0 : i32
    return %arg0, %c0_i32 : i32, i32
  }
}

</mosaic_0001>

<bundles_post_ra>
// kernel: linear_regression_model_forward.1
= control target key start
LH: loop header
LB: loop body
LE: loop exit
PB: predicated region body
PF: predicated region fallthrough
CT: control target
= control target key end

     0   :  { %12 = vsyncpa [#allocation3], 0  ;;  %v302_v1 = vmov 0.0   ;;  %vm303_vm0 = vmmov 0   ;;  %vm34_vm1 = vcmask 130048   ;;  %s376_s0 = inlined_call_operand.vmem [shape: f32[8,16], index: 0, kind: input, shape index: {}]   ;;  %s377_s1 = inlined_call_operand.vmem [shape: f32[16,32], index: 1, kind: input, shape index: {}]   ;;  %s378_s2 = inlined_call_operand.vmem [shape: f32[1,32], index: 2, kind: input, shape index: {}]   ;;  %s379_s3 = inlined_call_operand.vmem [shape: f32[32,8], index: 3, kind: input, shape index: {}]   ;;  %s380_s4 = inlined_call_operand.vmem [shape: f32[1,8], index: 4, kind: input, shape index: {}]   ;;  %s381_s5 = inlined_call_operand.hbm [shape: f32[8,32], index: 5, kind: output, shape index: {0}]   ;;  %s382_s6 = inlined_call_operand.hbm [shape: f32[8,8], index: 6, kind: output, shape index: {1}]  }
   0x1   :  { %v26_v0 = vld [vmem:[%s377_s1 + $0x8] sm:$0xff]  ;;  %236 = vmatprep.subr.mxu0 %v302_v1  ;;  %v25_v2 = vld [vmem:[%s377_s1] sm:$0xff]  ;;  %240 = vmatprep.mubr.msk.f32.mxu0 %vm303_vm0, %v302_v1  ;;  %v113_v3 = vld [vmem:[%s379_s3 + $0x18] sm:$0xff] }
   0x2   :  { %237 = vmatpush3.msra.mxu0 %v26_v0  ;;  %v24_v4 = vld [vmem:[%s376_s0] sm:$0xff]  ;;  %243 = vmatprep.subr.mxu1 %v302_v1  ;;  %v112_v5 = vld [vmem:[%s379_s3 + $0x10] sm:$0xff] }
   0x3   :  { %13 = vsyncpa [#allocation5], 0  ;;  %238 = vmatprep.subr.mxu0 %v302_v1  ;;  %244 = vmatpush3.msra.mxu1 %v113_v3  ;;  %v111_v6 = vld [vmem:[%s379_s3 + $0x8] sm:$0xff]  ;;  %v110_v7 = vld [vmem:[%s379_s3] sm:$0xff]  ;;  %vm108_vm2 = vcmask 261120   ;;  %s304_s11 = smov [#allocation2]  }
   0x4   :  { %239 = vmatpush3.msra.mxu0 %v25_v2  ;;  %245 = vmatprep.subr.mxu1 %v302_v1  ;;  %v224_v8 = vld [vmem:[%s378_s2] ss:$0 sm:$0xff]  ;;  %s202_s12 = sshll.u32 %s304_s11, 4  ;;  %s203_s12 = int_to_ptr.vmem [resolvable:$true] %s202_s12 }
   0x5   :  { %241 = vmatmul.mubr.msk.f32.vlgmr.msra.gmra.mxu0 %vm34_vm1, %v24_v4  ;;  %246 = vmatpush3.msra.mxu1 %v112_v5  ;;  %s258_s13 = scalar_lea.vmem %s203_s12, 128  ;;  %p263_p1 = scmp.lt.s32.totalorder %s203_s12, %s203_s12 }
   0x6   :  { %247 = vmatprep.subr.mxu1 %v302_v1  ;;  %251 = vmatprep.mubr.msk.f32.mxu1 %vm303_vm0, %v302_v1  ;;  %p259_p0 = scmp.ne.s32.totalorder %s203_s12, %s258_s13  ;;  %p264_p2 = scmp.lt.s32.totalorder %s258_s13, %s258_s13 }
   0x7   :  { %248 = vmatpush3.msra.mxu1 %v111_v6 }
   0x8   :  { %249 = vmatprep.subr.mxu1 %v302_v1  ;;  %p265_p3 = por %p264_p2, %p263_p1 }
   0x9   :  { %250 = vmatpush3.msra.mxu1 %v110_v7 }
   0xa   :  { %p266_p4 = pnand %p265_p3, %p259_p0 }
  0xc5   :  { %v104_v9 = vpop.f32.mrf.mxu0 }
  0xc6   :  { %v105_v10 = vadd.f32 %v224_v8, %v104_v9 }
  0xc7   :  { %v242_v11 = vpop.f32.mrf.mxu0 }
  0xc8   :  { %252 = vmatmul.mubr.msk.f32.vlgmr.msra.gmra.mxu1 %vm108_vm2, %v105_v10  ;;  %109 = vst.msk [vmem:[#allocation2] sm:$0xff] %vm108_vm2, %v105_v10 }
  0xc9   :  { %269 = shalt.err (!%p266_p4)
}
  0xca   :  { %205 = dma.vmem_to_hbm [thread:$0]  %s203_s12, 128, %s381_s5, [#allocation3]   ;;  %v226_v12 = vld [vmem:[%s380_s4] ss:$0 sm:$0xff]  ;;  %vm194_vm3 = vcmask 64512  }
  0xcb   :  { %s305_s16 = smov [#allocation4]  }
  0xcc   :  { %s212_s17 = sshll.u32 %s305_s16, 4  ;;  %s213_s17 = int_to_ptr.vmem [resolvable:$true] %s212_s17 }
  0xcd   :  { %s278_s18 = scalar_lea.vmem %s213_s17, 128  ;;  %p283_p6 = scmp.lt.s32.totalorder %s213_s17, %s213_s17 }
  0xce   :  { %p279_p5 = scmp.ne.s32.totalorder %s213_s17, %s278_s18  ;;  %p284_p7 = scmp.lt.s32.totalorder %s278_s18, %s278_s18 }
  0xd0   :  { %p285_p8 = por %p284_p7, %p283_p6 }
  0xd2   :  { %p286_p9 = pnand %p285_p8, %p279_p5 }
 0x188   :  { %v190_v13 = vpop.f32.mrf.mxu1 }
 0x189   :  { %v191_v14 = vadd.f32 %v226_v12, %v190_v13 }
 0x18a   :  { %v253_v15 = vpop.f32.mrf.mxu1 }
 0x18b   :  { %195 = vst.msk [vmem:[#allocation4] sm:$0xff] %vm194_vm3, %v191_v14 }
 0x18c   :  { %289 = shalt.err (!%p286_p9)
}
 0x18d   :  { %215 = dma.vmem_to_hbm [thread:$0]  %s213_s17, 128, %s382_s6, [#allocation5]  }
 0x18e   :  { %298 = dma.done.wait [#allocation3], 128  }
 0x18f   :  { %299 = vsyncadd [#allocation3], 4294967168 }
 0x190   :  { %300 = dma.done.wait [#allocation5], 128  }
 0x191   :  { %301 = vsyncadd [#allocation5], 4294967168 }
 0x192   :  { %222 = vsyncpa [#allocation3], 1 }
 0x193   :  { %223 = vsyncpa [#allocation5], 1 }

</bundles_post_ra>
